<compile_context>
chip_gen: v7x
topology: tpu7x:2x2x1
jax: 0.10.0
libtpu: 0.0.40
codegen_flags: <defaults>
</compile_context>

<pallas_src>
import jax
import jax.numpy as jnp
import numpy as np
from jax.experimental import pallas as pl
from jax.experimental.pallas import tpu as pltpu

MAX_LENGTH = 10      # attention length L
HIDDEN = 32          # hidden_size H (small stand-in for 256)
OUTPUT_SIZE = 20     # output vocab V

L = MAX_LENGTH
H = HIDDEN
V = OUTPUT_SIZE

GH_OFF = 32          # lane offset of the fused GRU hidden-gates block (32-aligned)
FUSED_W = 128        # width of the fused [W_attn | W_h] weight (one vreg of lanes)
OUT_LANES = 128      # packed output slab: logp@0:32 | h_new@32:64 | attn_w@64:96
BIAS_W = 128         # bias slab lane width

assert V <= 32 and L <= 32 and H <= 32 and GH_OFF + 3 * H <= FUSED_W, (
    "packed-slab layout assumes H, L, V <= 32; re-derive GH_OFF / FUSED_W / OUT_LANES "
    "(and the bias slab width) before scaling to H=256.")


def _attn_decoder_kernel(
    tokens_ref,     # SMEM [T] int32 (scalar prefetch): teacher-forced token ids
    emb_tab_ref,    # VMEM [V, 1, H] f32 embedding table (row-gathered, not a matmul operand)
    hid0_ref,       # VMEM [1, H]    f32 initial hidden
    enc_ref,        # VMEM [L, H]    f32 encoder outputs
    w_fused_ref,    # VMEM [2H, 128] bf16: cols 0:L = W_attn; rows H:2H cols 32:32+3H = W_h
    w_comb_ref,     # VMEM [2H, H]   bf16 attn_combine
    w_i_ref,        # VMEM [H, 3H]   bf16 GRU input->gates (r | z | n)
    w_out_ref,      # VMEM [H, V]    bf16 output projection
    bias_ref,       # VMEM [8, 128]  f32: rows = b_attn, b_comb, b_ih, b_hh, b_out
    out_ref,        # VMEM [1, 1, 128] f32 per-step packed slab
    h_scr,          # VMEM scratch [1, H] f32: hidden carried across grid steps
):
    f32 = jnp.float32
    bf16 = jnp.bfloat16
    step = pl.program_id(0)

    @pl.when(step == 0)
    def _():
        h_scr[...] = hid0_ref[...]

    h = h_scr[...]                                             # [1, H] f32
    biases = bias_ref[...]                                     # [8, 128] f32

    # ---- embedding lookup = dynamic single-row load (no one-hot matmul)
    tok = tokens_ref[step]
    emb = emb_tab_ref[tok]                                     # [1, H] f32
    # TODO(synk): dropout on `emb` skipped (identity / eval mode).

    # ---- fused matmul: cat(emb, h) @ [[W_attn_top, 0], [W_attn_bot, W_h]]
    #   lanes 0:L              -> attention logits (pre-bias)
    #   lanes GH_OFF:GH_OFF+3H -> gh = h @ W_h   (pre-bias)
    emb_h = jnp.concatenate([emb, h], axis=-1).astype(bf16)    # [1, 2H] bf16
    fused = jnp.dot(emb_h, w_fused_ref[...], preferred_element_type=f32)   # [1, 128] f32
    attn_logits = fused[:, 0:L] + biases[0:1, 0:L]
    gh = fused[:, GH_OFF:GH_OFF + 3 * H] + biases[3:4, 0:3 * H]

    # ---- softmax(dim=1) over attention logits (exact reciprocal: sums to 1)
    m = jnp.max(attn_logits, axis=-1, keepdims=True)
    e = jnp.exp(attn_logits - m)
    attn_w = e / jnp.sum(e, axis=-1, keepdims=True)            # [1, L]

    # ---- bmm(attn_weights, encoder_outputs): [1,L] @ [L,H] -> [1,H]
    attn_applied = jnp.dot(attn_w, enc_ref[...], preferred_element_type=f32)

    # ---- attn_combine: Linear(2H -> H) on cat(embedded, attn_applied), then ReLU
    emb_ctx = jnp.concatenate([emb, attn_applied], axis=-1).astype(bf16)   # [1, 2H]
    combined = (jnp.dot(emb_ctx, w_comb_ref[...], preferred_element_type=f32)
                + biases[1:2, 0:H])
    x = jnp.maximum(combined, 0.0)                             # [1, H] f32

    # ---- GRU cell (PyTorch gate order r, z, n); gh was produced by the fused matmul
    gi = (jnp.dot(x.astype(bf16), w_i_ref[...], preferred_element_type=f32)
          + biases[2:3, 0:3 * H])
    r = jax.nn.sigmoid(gi[:, 0:H] + gh[:, 0:H])
    z = jax.nn.sigmoid(gi[:, H:2 * H] + gh[:, H:2 * H])
    n = jnp.tanh(gi[:, 2 * H:3 * H] + r * gh[:, 2 * H:3 * H])
    h_new = (1.0 - z) * n + z * h                              # [1, H] f32
    h_scr[...] = h_new                                         # carry to next grid step

    # ---- out: Linear(H -> V) then log_softmax(dim=1)
    out_logits = (jnp.dot(h_new.astype(bf16), w_out_ref[...], preferred_element_type=f32)
                  + biases[4:5, 0:V])
    mo = jnp.max(out_logits, axis=-1, keepdims=True)
    s = out_logits - mo
    logp = s - jnp.log(jnp.sum(jnp.exp(s), axis=-1, keepdims=True))        # [1, V]

    # ---- lane-dense packed store, sections aligned to 32-lane boundaries
    row = jnp.concatenate(
        [logp, jnp.zeros((1, 32 - V), f32),
         h_new,
         attn_w, jnp.zeros((1, 32 - L), f32),
         jnp.zeros((1, OUT_LANES - 96), f32)],
        axis=-1)                                               # [1, 128]
    out_ref[...] = row.reshape(1, 1, OUT_LANES)


def attn_decoder_decode(params, tokens, hidden0, encoder_outputs):
    """Runs T teacher-forced AttnDecoderRNN.forward steps in ONE pallas_call.

    tokens:           int32 [T] token ids (one per decode step)
    hidden0:          [1, 1, H] float32 initial hidden
    encoder_outputs:  [L, H]    float32
    returns (log_probs [T, V], hiddens [T, H], attn_weights [T, L])
    """
    tokens = jnp.asarray(tokens, jnp.int32).reshape(-1)
    T = tokens.shape[0]
    # Guard out-of-range ids (PyTorch would raise; an OOB VMEM read would be silent).
    tokens = jnp.clip(tokens, 0, V - 1)
    hid2d = jnp.asarray(hidden0, jnp.float32).reshape(1, H)
    enc = jnp.asarray(encoder_outputs, jnp.float32)

    def const(shape):
        return pl.BlockSpec(shape, lambda t, tok_ref, _s=shape: (0,) * len(_s))

    grid_spec = pltpu.PrefetchScalarGridSpec(
        num_scalar_prefetch=1,
        grid=(T,),
        in_specs=[
            const((V, 1, H)),          # emb_table
            const((1, H)),             # hidden0
            const((L, H)),             # encoder_outputs
            const((2 * H, FUSED_W)),   # w_fused  (attn | W_h)
            const((2 * H, H)),         # w_comb
            const((H, 3 * H)),         # w_i
            const((H, V)),             # w_out
            const((8, BIAS_W)),        # bias slab
        ],
        out_specs=pl.BlockSpec((1, 1, OUT_LANES), lambda t, tok_ref: (t, 0, 0)),
        scratch_shapes=[pltpu.VMEM((1, H), jnp.float32)],
    )

    packed = pl.pallas_call(
        _attn_decoder_kernel,
        out_shape=jax.ShapeDtypeStruct((T, 1, OUT_LANES), jnp.float32),
        grid_spec=grid_spec,
        compiler_params=pltpu.CompilerParams(dimension_semantics=("arbitrary",)),
    )(
        tokens,
        params["emb_table"],
        hid2d,
        enc,
        params["w_fused"],
        params["w_comb"],
        params["w_i"],
        params["w_out"],
        params["bias_slab"],
    )

    packed = packed.reshape(T, OUT_LANES)
    log_probs = packed[:, 0:V]            # [T, V]
    hiddens = packed[:, 32:32 + H]        # [T, H]
    attn_weights = packed[:, 64:64 + L]   # [T, L]
    return log_probs, hiddens, attn_weights


def attn_decoder_forward(params, token, hidden, encoder_outputs):
    """Single-step call matching AttnDecoderRNN.forward's signature."""
    logp, hid, attn = attn_decoder_decode(
        params, jnp.asarray(token, jnp.int32).reshape(1), hidden, encoder_outputs)
    return logp, hid.reshape(1, 1, H), attn


def init_params(key):
    """Deterministic synthetic parameters, pre-packed for the kernel."""
    f32 = jnp.float32
    bf16 = jnp.bfloat16
    ks = jax.random.split(key, 12)
    s = 0.1

    emb_table = s * jax.random.normal(ks[0], (V, H), f32)

    # attn: Linear(2H -> L); stored transposed so cat(embedded, hidden) @ W works.
    w_attn = s * jax.random.normal(ks[1], (2 * H, L), f32)
    b_attn = s * jax.random.normal(ks[2], (L,), f32)

    # attn_combine: Linear(2H -> H)
    w_comb = s * jax.random.normal(ks[3], (2 * H, H), f32)
    b_comb = s * jax.random.normal(ks[4], (H,), f32)

    # GRU(H, H): gates packed column-wise in PyTorch (r | z | n) order.
    w_ih = s * jax.random.normal(ks[5], (H, 3 * H), f32)
    w_hh = s * jax.random.normal(ks[6], (H, 3 * H), f32)
    b_ih = s * jax.random.normal(ks[7], (3 * H,), f32)
    b_hh = s * jax.random.normal(ks[8], (3 * H,), f32)

    # out: Linear(H -> V)
    w_out = s * jax.random.normal(ks[9], (H, V), f32)
    b_out = s * jax.random.normal(ks[10], (V,), f32)

    # Fused [W_attn | W_h] weight: one [2H, 128] bf16 matmul operand.
    #   cols 0:L             : W_attn (both emb and hidden rows)
    #   rows H:2H, cols 32:128: W_h   (hidden rows only; emb rows stay zero)
    w_fused = jnp.zeros((2 * H, FUSED_W), f32)
    w_fused = w_fused.at[:, 0:L].set(w_attn)
    w_fused = w_fused.at[H:2 * H, GH_OFF:GH_OFF + 3 * H].set(w_hh)

    # All biases in one (8, 128) f32 vreg-sized slab, one bias per sublane.
    def _row(vec):
        return jnp.pad(vec, (0, BIAS_W - vec.shape[0]))

    zero = jnp.zeros((BIAS_W,), f32)
    bias_slab = jnp.stack(
        [_row(b_attn), _row(b_comb), _row(b_ih), _row(b_hh), _row(b_out),
         zero, zero, zero],
        axis=0)                                                 # [8, 128]

    return dict(
        emb_table=emb_table.reshape(V, 1, H),   # f32: row-gathered inside the kernel
        w_fused=w_fused.astype(bf16),
        w_comb=w_comb.astype(bf16),
        w_i=w_ih.astype(bf16),
        w_out=w_out.astype(bf16),
        bias_slab=bias_slab,
    )


def reference_decode(params, tokens, hidden0, encoder_outputs):
    """Pure-JAX f32 reference using the same (bf16-quantized) weights."""
    f32 = jnp.float32
    w_fused = params["w_fused"].astype(f32)
    w_attn = w_fused[:, 0:L]
    w_hh = w_fused[H:2 * H, GH_OFF:GH_OFF + 3 * H]
    w_comb = params["w_comb"].astype(f32)
    w_ih = params["w_i"].astype(f32)
    w_out = params["w_out"].astype(f32)
    emb_tab = params["emb_table"].reshape(V, H)
    b = params["bias_slab"]
    b_attn, b_comb = b[0, 0:L], b[1, 0:H]
    b_ih, b_hh, b_out = b[2, 0:3 * H], b[3, 0:3 * H], b[4, 0:V]

    h = jnp.asarray(hidden0, f32).reshape(1, H)
    enc = jnp.asarray(encoder_outputs, f32)
    logps, hs, aws = [], [], []
    for t in range(int(tokens.shape[0])):
        emb = emb_tab[tokens[t]][None, :]
        attn_logits = jnp.concatenate([emb, h], -1) @ w_attn + b_attn
        aw = jax.nn.softmax(attn_logits, axis=-1)
        ctx = aw @ enc
        x = jax.nn.relu(jnp.concatenate([emb, ctx], -1) @ w_comb + b_comb)
        gi = x @ w_ih + b_ih
        gh = h @ w_hh + b_hh
        r = jax.nn.sigmoid(gi[:, 0:H] + gh[:, 0:H])
        z = jax.nn.sigmoid(gi[:, H:2 * H] + gh[:, H:2 * H])
        n = jnp.tanh(gi[:, 2 * H:] + r * gh[:, 2 * H:])
        h = (1.0 - z) * n + z * h
        logp = jax.nn.log_softmax(h @ w_out + b_out, axis=-1)
        logps.append(logp); hs.append(h); aws.append(aw)
    return (jnp.concatenate(logps, 0), jnp.concatenate(hs, 0), jnp.concatenate(aws, 0))


if __name__ == "__main__":
    key = jax.random.PRNGKey(0)
    pkey, ekey, tkey = jax.random.split(key, 3)
    params = init_params(pkey)

    tokens = jax.random.randint(tkey, (MAX_LENGTH,), 0, OUTPUT_SIZE).astype(jnp.int32)
    hidden0 = jnp.zeros((1, 1, HIDDEN), jnp.float32)            # init_hidden()
    encoder_outputs = jax.random.normal(ekey, (MAX_LENGTH, HIDDEN), jnp.float32)

    # Fused multi-step decode: one pallas_call for all MAX_LENGTH steps.
    log_probs, hiddens, attn_weights = attn_decoder_decode(
        params, tokens, hidden0, encoder_outputs)
    jax.block_until_ready((log_probs, hiddens, attn_weights))
    assert log_probs.shape == (MAX_LENGTH, OUTPUT_SIZE)
    assert hiddens.shape == (MAX_LENGTH, HIDDEN)
    assert attn_weights.shape == (MAX_LENGTH, MAX_LENGTH)

    # Single-step call matching the original forward() signature.
    lp1, h1, aw1 = attn_decoder_forward(params, tokens[0], hidden0, encoder_outputs)
    jax.block_until_ready((lp1, h1, aw1))
    assert lp1.shape == (1, OUTPUT_SIZE)
    assert h1.shape == (1, 1, HIDDEN)
    assert aw1.shape == (1, MAX_LENGTH)

    # Parity vs a pure-JAX f32 reference (same quantized weights; bf16 operand
    # rounding inside the kernel is the only divergence).
    ref_lp, ref_h, ref_aw = reference_decode(params, tokens, hidden0, encoder_outputs)
    np.testing.assert_allclose(np.asarray(log_probs), np.asarray(ref_lp), rtol=3e-2, atol=3e-2)
    np.testing.assert_allclose(np.asarray(hiddens), np.asarray(ref_h), rtol=3e-2, atol=3e-2)
    np.testing.assert_allclose(np.asarray(attn_weights), np.asarray(ref_aw), rtol=3e-2, atol=3e-2)

    print("KERNEL_OK")
</pallas_src>

<mosaic_0001>
module attributes {stable_mosaic.version = 11 : i64} {
  func.func @_attn_decoder_kernel(%arg0: i32, %arg1: memref<10xi32, #tpu.memory_space<smem>>, %arg2: memref<20x1x32xf32, #tpu.memory_space<vmem>>, %arg3: memref<1x32xf32, #tpu.memory_space<vmem>>, %arg4: memref<10x32xf32, #tpu.memory_space<vmem>>, %arg5: memref<64x128xbf16, #tpu.memory_space<vmem>>, %arg6: memref<64x32xbf16, #tpu.memory_space<vmem>>, %arg7: memref<32x96xbf16, #tpu.memory_space<vmem>>, %arg8: memref<32x20xbf16, #tpu.memory_space<vmem>>, %arg9: memref<8x128xf32, #tpu.memory_space<vmem>>, %arg10: memref<1x1x128xf32, #tpu.memory_space<vmem>>, %arg11: memref<1x32xf32, #tpu.memory_space<vmem>>) attributes {dimension_semantics = [#tpu.dimension_semantics<arbitrary>], iteration_bounds = array<i64: 10>, scalar_prefetch = 1 : i64, scratch_operands = 1 : i64, tpu.core_type = #tpu.core_type<tc>, window_params = [{pipeline_mode = #tpu.pipeline_mode<synchronous>, transform_indices = @transform_0, window_bounds = array<i64: 20, 1, 32>}, {pipeline_mode = #tpu.pipeline_mode<synchronous>, transform_indices = @transform_1, window_bounds = array<i64: 1, 32>}, {pipeline_mode = #tpu.pipeline_mode<synchronous>, transform_indices = @transform_2, window_bounds = array<i64: 10, 32>}, {pipeline_mode = #tpu.pipeline_mode<synchronous>, transform_indices = @transform_3, window_bounds = array<i64: 64, 128>}, {pipeline_mode = #tpu.pipeline_mode<synchronous>, transform_indices = @transform_4, window_bounds = array<i64: 64, 32>}, {pipeline_mode = #tpu.pipeline_mode<synchronous>, transform_indices = @transform_5, window_bounds = array<i64: 32, 96>}, {pipeline_mode = #tpu.pipeline_mode<synchronous>, transform_indices = @transform_6, window_bounds = array<i64: 32, 20>}, {pipeline_mode = #tpu.pipeline_mode<synchronous>, transform_indices = @transform_7, window_bounds = array<i64: 8, 128>}, {transform_indices = @transform_8, window_bounds = array<i64: 1, 1, 128>}]} {
    %c0_i32 = arith.constant 0 : i32
    %0 = arith.cmpi eq, %arg0, %c0_i32 : i32
    %1 = arith.extui %0 : i1 to i32
    %c0_i32_0 = arith.constant 0 : i32
    %2 = arith.cmpi ne, %1, %c0_i32_0 : i32
    scf.if %2 {
      %c0_36 = arith.constant 0 : index
      %c0_37 = arith.constant 0 : index
      %92 = vector.load %arg3[%c0_36, %c0_37] : memref<1x32xf32, #tpu.memory_space<vmem>>, vector<1x32xf32>
      %c0_38 = arith.constant 0 : index
      %c0_39 = arith.constant 0 : index
      %93 = vector.load %arg11[%c0_38, %c0_39] : memref<1x32xf32, #tpu.memory_space<vmem>>, vector<1x32xf32>
      tpu.vector_store %arg11[%c0_38, %c0_39], %92 {strides = array<i32>} : memref<1x32xf32, #tpu.memory_space<vmem>>, vector<1x32xf32>,
    } else {
    }
    %c0 = arith.constant 0 : index
    %c0_1 = arith.constant 0 : index
    %3 = vector.load %arg11[%c0, %c0_1] : memref<1x32xf32, #tpu.memory_space<vmem>>, vector<1x32xf32>
    %c0_2 = arith.constant 0 : index
    %c0_3 = arith.constant 0 : index
    %4 = vector.load %arg9[%c0_2, %c0_3] : memref<8x128xf32, #tpu.memory_space<vmem>>, vector<8x128xf32>
    %5 = arith.index_cast %arg0 : i32 to index
    %6 = memref.load %arg1[%5] : memref<10xi32, #tpu.memory_space<smem>>
    %7 = arith.index_cast %6 : i32 to index
    %c0_4 = arith.constant 0 : index
    %c0_5 = arith.constant 0 : index
    %8 = vector.load %arg2[%7, %c0_4, %c0_5] : memref<20x1x32xf32, #tpu.memory_space<vmem>>, vector<1x1x32xf32>
    %9 = vector.shape_cast %8 : vector<1x1x32xf32> to vector<1x32xf32>
    %10 = tpu.concatenate %9, %3 in 1 : vector<1x32xf32>, vector<1x32xf32> -> vector<1x64xf32>
    %11 = arith.truncf %10 : vector<1x64xf32> to vector<1x64xbf16>
    %c0_6 = arith.constant 0 : index
    %c0_7 = arith.constant 0 : index
    %12 = vector.load %arg5[%c0_6, %c0_7] : memref<64x128xbf16, #tpu.memory_space<vmem>>, vector<64x128xbf16>
    %cst = arith.constant dense<0.000000e+00> : vector<1x128xf32>
    %13 = tpu.matmul %11, %12, %cst {dimension_numbers = #tpu.dot_dimension_numbers<[1], [0], [0], [1], [0, 0, 1, 1], [], []>} : vector<1x64xbf16>, vector<64x128xbf16>, vector<1x128xf32> -> vector<1x128xf32>
    %14 = vector.extract_strided_slice %13 {offsets = [0, 0], sizes = [1, 10], strides = [1, 1]} : vector<1x128xf32> to vector<1x10xf32>
    %15 = vector.extract_strided_slice %4 {offsets = [0, 0], sizes = [1, 10], strides = [1, 1]} : vector<8x128xf32> to vector<1x10xf32>
    %16 = arith.addf %14, %15 : vector<1x10xf32>
    %17 = vector.extract_strided_slice %13 {offsets = [0, 32], sizes = [1, 96], strides = [1, 1]} : vector<1x128xf32> to vector<1x96xf32>
    %18 = vector.extract_strided_slice %4 {offsets = [3, 0], sizes = [1, 96], strides = [1, 1]} : vector<8x128xf32> to vector<1x96xf32>
    %19 = arith.addf %17, %18 : vector<1x96xf32>
    %cst_8 = arith.constant dense<0xFF800000> : vector<1xf32>
    %20 = vector.multi_reduction <maximumf>, %16, %cst_8 [1] : vector<1x10xf32> to vector<1xf32>
    %21 = vector.shape_cast %20 : vector<1xf32> to vector<1x1xf32>
    %22 = vector.broadcast %21 : vector<1x1xf32> to vector<1x10xf32>
    %23 = arith.subf %16, %22 : vector<1x10xf32>
    %24 = math.exp %23 : vector<1x10xf32>
    %cst_9 = arith.constant dense<0.000000e+00> : vector<1xf32>
    %25 = vector.multi_reduction <add>, %24, %cst_9 [1] : vector<1x10xf32> to vector<1xf32>
    %26 = vector.shape_cast %25 : vector<1xf32> to vector<1x1xf32>
    %27 = vector.broadcast %26 : vector<1x1xf32> to vector<1x10xf32>
    %28 = arith.divf %24, %27 : vector<1x10xf32>
    %c0_10 = arith.constant 0 : index
    %c0_11 = arith.constant 0 : index
    %29 = vector.load %arg4[%c0_10, %c0_11] : memref<10x32xf32, #tpu.memory_space<vmem>>, vector<10x32xf32>
    %cst_12 = arith.constant dense<0.000000e+00> : vector<1x32xf32>
    %30 = tpu.matmul %28, %29, %cst_12 {dimension_numbers = #tpu.dot_dimension_numbers<[1], [0], [0], [1], [0, 0, 1, 1], [], []>} : vector<1x10xf32>, vector<10x32xf32>, vector<1x32xf32> -> vector<1x32xf32>
    %31 = tpu.concatenate %9, %30 in 1 : vector<1x32xf32>, vector<1x32xf32> -> vector<1x64xf32>
    %32 = arith.truncf %31 : vector<1x64xf32> to vector<1x64xbf16>
    %c0_13 = arith.constant 0 : index
    %c0_14 = arith.constant 0 : index
    %33 = vector.load %arg6[%c0_13, %c0_14] : memref<64x32xbf16, #tpu.memory_space<vmem>>, vector<64x32xbf16>
    %cst_15 = arith.constant dense<0.000000e+00> : vector<1x32xf32>
    %34 = tpu.matmul %32, %33, %cst_15 {dimension_numbers = #tpu.dot_dimension_numbers<[1], [0], [0], [1], [0, 0, 1, 1], [], []>} : vector<1x64xbf16>, vector<64x32xbf16>, vector<1x32xf32> -> vector<1x32xf32>
    %35 = vector.extract_strided_slice %4 {offsets = [1, 0], sizes = [1, 32], strides = [1, 1]} : vector<8x128xf32> to vector<1x32xf32>
    %36 = arith.addf %34, %35 : vector<1x32xf32>
    %cst_16 = arith.constant 0.000000e+00 : f32
    %37 = vector.broadcast %cst_16 : f32 to vector<1x32xf32>
    %38 = arith.maximumf %36, %37 : vector<1x32xf32>
    %39 = arith.truncf %38 : vector<1x32xf32> to vector<1x32xbf16>
    %c0_17 = arith.constant 0 : index
    %c0_18 = arith.constant 0 : index
    %40 = vector.load %arg7[%c0_17, %c0_18] : memref<32x96xbf16, #tpu.memory_space<vmem>>, vector<32x96xbf16>
    %cst_19 = arith.constant dense<0.000000e+00> : vector<1x96xf32>
    %41 = tpu.matmul %39, %40, %cst_19 {dimension_numbers = #tpu.dot_dimension_numbers<[1], [0], [0], [1], [0, 0, 1, 1], [], []>} : vector<1x32xbf16>, vector<32x96xbf16>, vector<1x96xf32> -> vector<1x96xf32>
    %42 = vector.extract_strided_slice %4 {offsets = [2, 0], sizes = [1, 96], strides = [1, 1]} : vector<8x128xf32> to vector<1x96xf32>
    %43 = arith.addf %41, %42 : vector<1x96xf32>
    %44 = vector.extract_strided_slice %43 {offsets = [0, 0], sizes = [1, 32], strides = [1, 1]} : vector<1x96xf32> to vector<1x32xf32>
    %45 = vector.extract_strided_slice %19 {offsets = [0, 0], sizes = [1, 32], strides = [1, 1]} : vector<1x96xf32> to vector<1x32xf32>
    %46 = arith.addf %44, %45 : vector<1x32xf32>
    %47 = arith.negf %46 : vector<1x32xf32>
    %48 = math.exp %47 : vector<1x32xf32>
    %cst_20 = arith.constant 1.000000e+00 : f32
    %49 = vector.broadcast %cst_20 : f32 to vector<1x32xf32>
    %50 = arith.addf %49, %48 : vector<1x32xf32>
    %51 = arith.divf %49, %50 : vector<1x32xf32>
    %52 = vector.extract_strided_slice %43 {offsets = [0, 32], sizes = [1, 32], strides = [1, 1]} : vector<1x96xf32> to vector<1x32xf32>
    %53 = vector.extract_strided_slice %19 {offsets = [0, 32], sizes = [1, 32], strides = [1, 1]} : vector<1x96xf32> to vector<1x32xf32>
    %54 = arith.addf %52, %53 : vector<1x32xf32>
    %55 = arith.negf %54 : vector<1x32xf32>
    %56 = math.exp %55 : vector<1x32xf32>
    %cst_21 = arith.constant 1.000000e+00 : f32
    %57 = vector.broadcast %cst_21 : f32 to vector<1x32xf32>
    %58 = arith.addf %57, %56 : vector<1x32xf32>
    %59 = arith.divf %57, %58 : vector<1x32xf32>
    %60 = vector.extract_strided_slice %43 {offsets = [0, 64], sizes = [1, 32], strides = [1, 1]} : vector<1x96xf32> to vector<1x32xf32>
    %61 = vector.extract_strided_slice %19 {offsets = [0, 64], sizes = [1, 32], strides = [1, 1]} : vector<1x96xf32> to vector<1x32xf32>
    %62 = arith.mulf %51, %61 : vector<1x32xf32>
    %63 = arith.addf %60, %62 : vector<1x32xf32>
    %64 = math.tanh %63 : vector<1x32xf32>
    %cst_22 = arith.constant 1.000000e+00 : f32
    %65 = vector.broadcast %cst_22 : f32 to vector<1x32xf32>
    %66 = arith.subf %65, %59 : vector<1x32xf32>
    %67 = arith.mulf %66, %64 : vector<1x32xf32>
    %68 = arith.mulf %59, %3 : vector<1x32xf32>
    %69 = arith.addf %67, %68 : vector<1x32xf32>
    %c0_23 = arith.constant 0 : index
    %c0_24 = arith.constant 0 : index
    %70 = vector.load %arg11[%c0_23, %c0_24] : memref<1x32xf32, #tpu.memory_space<vmem>>, vector<1x32xf32>
    tpu.vector_store %arg11[%c0_23, %c0_24], %69 {strides = array<i32>} : memref<1x32xf32, #tpu.memory_space<vmem>>, vector<1x32xf32>,
    %71 = arith.truncf %69 : vector<1x32xf32> to vector<1x32xbf16>
    %c0_25 = arith.constant 0 : index
    %c0_26 = arith.constant 0 : index
    %72 = vector.load %arg8[%c0_25, %c0_26] : memref<32x20xbf16, #tpu.memory_space<vmem>>, vector<32x20xbf16>
    %cst_27 = arith.constant dense<0.000000e+00> : vector<1x20xf32>
    %73 = tpu.matmul %71, %72, %cst_27 {dimension_numbers = #tpu.dot_dimension_numbers<[1], [0], [0], [1], [0, 0, 1, 1], [], []>} : vector<1x32xbf16>, vector<32x20xbf16>, vector<1x20xf32> -> vector<1x20xf32>
    %74 = vector.extract_strided_slice %4 {offsets = [4, 0], sizes = [1, 20], strides = [1, 1]} : vector<8x128xf32> to vector<1x20xf32>
    %75 = arith.addf %73, %74 : vector<1x20xf32>
    %cst_28 = arith.constant dense<0xFF800000> : vector<1xf32>
    %76 = vector.multi_reduction <maximumf>, %75, %cst_28 [1] : vector<1x20xf32> to vector<1xf32>
    %77 = vector.shape_cast %76 : vector<1xf32> to vector<1x1xf32>
    %78 = vector.broadcast %77 : vector<1x1xf32> to vector<1x20xf32>
    %79 = arith.subf %75, %78 : vector<1x20xf32>
    %80 = math.exp %79 : vector<1x20xf32>
    %cst_29 = arith.constant dense<0.000000e+00> : vector<1xf32>
    %81 = vector.multi_reduction <add>, %80, %cst_29 [1] : vector<1x20xf32> to vector<1xf32>
    %82 = vector.shape_cast %81 : vector<1xf32> to vector<1x1xf32>
    %83 = math.log %82 : vector<1x1xf32>
    %84 = vector.broadcast %83 : vector<1x1xf32> to vector<1x20xf32>
    %85 = arith.subf %79, %84 : vector<1x20xf32>
    %cst_30 = arith.constant 0.000000e+00 : f32
    %86 = vector.broadcast %cst_30 : f32 to vector<1x12xf32>
    %cst_31 = arith.constant 0.000000e+00 : f32
    %87 = vector.broadcast %cst_31 : f32 to vector<1x22xf32>
    %cst_32 = arith.constant 0.000000e+00 : f32
    %88 = vector.broadcast %cst_32 : f32 to vector<1x32xf32>
    %89 = tpu.concatenate %85, %86, %69, %28, %87, %88 in 1 : vector<1x20xf32>, vector<1x12xf32>, vector<1x32xf32>, vector<1x10xf32>, vector<1x22xf32>, vector<1x32xf32> -> vector<1x128xf32>
    %90 = vector.shape_cast %89 : vector<1x128xf32> to vector<1x1x128xf32>
    %c0_33 = arith.constant 0 : index
    %c0_34 = arith.constant 0 : index
    %c0_35 = arith.constant 0 : index
    %91 = vector.load %arg10[%c0_33, %c0_34, %c0_35] : memref<1x1x128xf32, #tpu.memory_space<vmem>>, vector<1x1x128xf32>
    tpu.vector_store %arg10[%c0_33, %c0_34, %c0_35], %90 {strides = array<i32>} : memref<1x1x128xf32, #tpu.memory_space<vmem>>, vector<1x1x128xf32>,
    return
  }
  func.func @transform_0(%arg0: i32, %arg1: memref<10xi32, #tpu.memory_space<smem>>) -> (i32, i32, i32) {
    %c0_i32 = arith.constant 0 : i32
    %c0_i32_0 = arith.constant 0 : i32
    %c0_i32_1 = arith.constant 0 : i32
    %c0_i32_2 = arith.constant 0 : i32
    return %c0_i32, %c0_i32_0, %c0_i32_1 : i32, i32, i32
  }
  func.func @transform_1(%arg0: i32, %arg1: memref<10xi32, #tpu.memory_space<smem>>) -> (i32, i32) {
    %c0_i32 = arith.constant 0 : i32
    %c0_i32_0 = arith.constant 0 : i32
    %c0_i32_1 = arith.constant 0 : i32
    return %c0_i32, %c0_i32_0 : i32, i32
  }
  func.func @transform_2(%arg0: i32, %arg1: memref<10xi32, #tpu.memory_space<smem>>) -> (i32, i32) {
    %c0_i32 = arith.constant 0 : i32
    %c0_i32_0 = arith.constant 0 : i32
    %c0_i32_1 = arith.constant 0 : i32
    return %c0_i32, %c0_i32_0 : i32, i32
  }
  func.func @transform_3(%arg0: i32, %arg1: memref<10xi32, #tpu.memory_space<smem>>) -> (i32, i32) {
    %c0_i32 = arith.constant 0 : i32
    %c0_i32_0 = arith.constant 0 : i32
    %c0_i32_1 = arith.constant 0 : i32
    return %c0_i32, %c0_i32_0 : i32, i32
  }
  func.func @transform_4(%arg0: i32, %arg1: memref<10xi32, #tpu.memory_space<smem>>) -> (i32, i32) {
    %c0_i32 = arith.constant 0 : i32
    %c0_i32_0 = arith.constant 0 : i32
    %c0_i32_1 = arith.constant 0 : i32
    return %c0_i32, %c0_i32_0 : i32, i32
  }
  func.func @transform_5(%arg0: i32, %arg1: memref<10xi32, #tpu.memory_space<smem>>) -> (i32, i32) {
    %c0_i32 = arith.constant 0 : i32
    %c0_i32_0 = arith.constant 0 : i32
    %c0_i32_1 = arith.constant 0 : i32
    return %c0_i32, %c0_i32_0 : i32, i32
  }
  func.func @transform_6(%arg0: i32, %arg1: memref<10xi32, #tpu.memory_space<smem>>) -> (i32, i32) {
    %c0_i32 = arith.constant 0 : i32
    %c0_i32_0 = arith.constant 0 : i32
    %c0_i32_1 = arith.constant 0 : i32
    return %c0_i32, %c0_i32_0 : i32, i32
  }
  func.func @transform_7(%arg0: i32, %arg1: memref<10xi32, #tpu.memory_space<smem>>) -> (i32, i32) {
    %c0_i32 = arith.constant 0 : i32
    %c0_i32_0 = arith.constant 0 : i32
    %c0_i32_1 = arith.constant 0 : i32
    return %c0_i32, %c0_i32_0 : i32, i32
  }
  func.func @transform_8(%arg0: i32, %arg1: memref<10xi32, #tpu.memory_space<smem>>) -> (i32, i32, i32) {
    %c0_i32 = arith.constant 0 : i32
    %c0_i32_0 = arith.constant 0 : i32
    %c0_i32_1 = arith.constant 0 : i32
    return %arg0, %c0_i32, %c0_i32_0 : i32, i32, i32
  }
}

</mosaic_0001>

<bundles_post_ra>
// kernel: tpu_custom_call.1
= control target key start
LH: loop header
LB: loop body
LE: loop exit
PB: predicated region body
PF: predicated region fallthrough
CT: control target
= control target key end

     0   :  { %s1448_s0 = inlined_call_operand.vmem [shape: s32[10], index: 0, kind: input, shape index: {}]   ;;  %s1449_s1 = inlined_call_operand.vmem [shape: f32[20,1,32], index: 1, kind: input, shape index: {}]   ;;  %s1450_s2 = inlined_call_operand.vmem [shape: f32[1,32], index: 2, kind: input, shape index: {}]   ;;  %s1451_s3 = inlined_call_operand.vmem [shape: f32[10,32], index: 3, kind: input, shape index: {}]   ;;  %s1452_s4 = inlined_call_operand.vmem [shape: bf16[64,128], index: 4, kind: input, shape index: {}]   ;;  %s1453_s5 = inlined_call_operand.vmem [shape: bf16[64,32], index: 5, kind: input, shape index: {}]   ;;  %s1454_s6 = inlined_call_operand.hbm [shape: bf16[32,96], index: 6, kind: input, shape index: {}]   ;;  %s1455_s7 = inlined_call_operand.vmem [shape: bf16[32,20], index: 7, kind: input, shape index: {}]   ;;  %s1456_s8 = inlined_call_operand.vmem [shape: f32[8,128], index: 8, kind: input, shape index: {}]   ;;  %s1457_s9 = inlined_call_operand.hbm [shape: f32[10,1,128], index: 9, kind: output, shape index: {}]  }
   0x1   :  { %s14_s11 = sshll.u32 %s1448_s0, 4  ;;  %s15_s11 = int_to_ptr.vmem [resolvable:$true] %s14_s11 }
   0x2   :  { %s1029_s12 = scalar_lea.vmem %s15_s11, 16  ;;  %p1034_p1 = scmp.lt.s32.totalorder %s15_s11, %s15_s11 }
   0x3   :  { %p1030_p0 = scmp.ne.s32.totalorder %s15_s11, %s1029_s12  ;;  %p1035_p2 = scmp.lt.s32.totalorder %s1029_s12, %s1029_s12 }
   0x5   :  { %p1036_p3 = por %p1035_p2, %p1034_p1 }
   0x7   :  { %p1037_p4 = pnand %p1036_p3, %p1030_p0 }
   0x9   :  { %1040 = shalt.err (!%p1037_p4)  }
   0xa   :  { %s1139_s13 = smov [#allocation4]  }
   0xb   :  { %17 = dma.vmem_to_smem %s15_s11, 16, %s1139_s13, [#allocation3] }
   0xc   :  { %1113 = dma.done.wait [#allocation3], 16 }
   0xd   :  { %1114 = vsyncadd [#allocation3], 4294967280 }
   0xe   :  { %19 = sfence }
   0xf   :  { %20 = vsyncpa [#allocation6], 0 }
  0x10   :  { %21 = vsyncpa [#allocation7], 0 }
  0x11   :  { %23 = vsyncpa [#allocation7 + $0x1], 0  ;;  %s1204_s14 = smov 0   ;;  %s1206_s15 = smov 0  }
  0x12   :  { %s1208_s0 = smov 0   ;;  %s1210_s16 = smov 0  }
  0x13 LB: > { %s1225_s17 = sadd.s32 4294967295, %s1137_s16   ;;  %s844_s18 = sadd.s32 4294967294, %s1137_s16   ;;  %s1137_s16 = sphi %s1210_s16, %s1474_s16   ;;  %s1133_s0 = sphi %s1208_s0, %s1473_s0   ;;  %s1129_s15 = sphi %s1206_s15, %s1472_s15   ;;  %s1125_s14 = sphi %s1204_s14, %s1471_s14  }
  0x14   : > { %s1229_s19 = sadd.s32 1, %s1137_s16   ;;  %s204_s20 = sadd.s32 1, %s1133_s0 }
  0x15   : > { %s201_s21 = ssub.s32 %s1137_s16, %s1229_s19  ;;  %p214_p5 = scmp.ne.s32.totalorder %s1133_s0, %s1129_s15 }
  0x16   : > { %p202_p6 = scmp.eq.s32.totalorder %s201_s21, 0  ;;  %p215_p7 = scmp.eq.s32.totalorder %s1225_s17, 9 }
  0x17   : > { %p220_p8 = scmp.ne.s32.totalorder %s1129_s15, %s1125_s14  ;;  %p221_p9 = scmp.eq.s32.totalorder %s844_s18, 9 }
  0x18   : > { %s1240_s22 = scalar_select %p202_p6, %s1133_s0, %s204_s20  }
  0x19   : > { %p1242_p10 = por %p215_p7, %p214_p5  ;;  %p1246_p11 = por %p221_p9, %p220_p8 }
  0x1a   : > { %p845_p12 = scmp.ge.s32.totalorder %s1137_s16, 1  ;;  %p228_p13 = scmp.lt.s32.totalorder %s1137_s16, 11 }
  0x1b   : > { %s1461_s23 = scalar_select %p1242_p10, 1, 0 }
  0x1c   : > { %s1462_s24 = scalar_select %p1246_p11, 1, 0 }
  0x1d   : > { %p1458_p1 = scmp.eq.s32.totalorder %s1225_s17, 0  ;;  %p1254_p2 = pnand %p845_p12, %p228_p13 }
  0x1e   : > { %s1140_s26 = smov [#allocation5]   ;;  %s1041_s10 = scalar_lea.hbm %s1454_s6, 256 }
  0x1f   : > { %s1463_s25 = scalar_select %p1254_p2, 1, 0 }
  0x20   : > { %s255_s27 = sshll.u32 %s1140_s26, 4  ;;  %p949_p3 = pneg %p1254_p2  ;;  %s256_s27 = int_to_ptr.vmem [resolvable:$true] %s255_s27 }
  0x21   : > { %p1042_p5 = scmp.ne.s32.totalorder %s1454_s6, %s1041_s10  ;;  %p1048_p9 = scmp.lt.u32.totalorder %s1041_s10, %s1454_s6 }
  0x22   : > { %p1262_p4 = pnand %p1458_p1, %p949_p3 }
  0x24   : > { %p1043_p6 = pneg %p1262_p4 }
  0x26   : > { %p1044_p7 = pnand %p1043_p6, %p1042_p5 }
  0x28   : > { %p1045_p8 = pneg %p1044_p7 }
  0x2a   : > { %p1050_p12 = pnand %p1048_p9, %p1045_p8 }
  0x2c   : > { %1053 = shalt.err (!%p1050_p12)
}
  0x2d   : > { %s1054_s20 = scalar_lea.vmem %s256_s27, 256  ;;  %p1062_p1 = scmp.lt.s32.totalorder %s256_s27, %s256_s27 }
  0x2e   : > { %p1055_p13 = scmp.ne.s32.totalorder %s256_s27, %s1054_s20  ;;  %p1063_p11 = scmp.lt.s32.totalorder %s1054_s20, %s1054_s20 }
  0x30   : > { %p1057_p3 = pnand %p1055_p13, %p1043_p6  ;;  %p1064_p10 = por %p1063_p11, %p1062_p1 }
  0x32   : > { %p1058_p0 = pneg %p1057_p3 }
  0x34   : > { %p1065_p2 = pnand %p1064_p10, %p1058_p0 }
  0x36   : > { %1068 = shalt.err (!%p1065_p2)
}
  0x37   : > { %s1141_s21 = smov 64   ;;  %s1142_s26 = smov 4  }
  0x38   : > { %952 = dma.hbm_to_vmem [thread:$0]  (!%p1262_p4), %s1454_s6, 256, %s256_s27, [#allocation6], %s1141_s21, %s1141_s21, %s1142_s26  }
  0x39   : > { %p1465_p5 = scmp.ne.s32.totalorder %s1463_s25, 0 }
  0x3a   : > { %p1466_p7 = scmp.eq.s32.totalorder (!%p1465_p5), %s1225_s17, 0 }
  0x3b   : > { %277 = sbr.rel (%p1465_p5) target bundleno = 2428 (0x97c), region = 52 }
  0x42   : > { %1116 = dma.done.wait (%p1466_p7), [#allocation6], 256   ;;  %p1467_p6 = pmov %p1466_p7 }
  0x43   : > { %s303_s10 = sand.u32 1, %s1129_s15   ;;  %p1468_p10 = scmp.ne.s32.totalorder %s1225_s17, 0 }
  0x44   : > { %1118 = vsyncadd (%p1467_p6), [#allocation6], 4294967040  ;;  %s1291_s11 = scalar_lea.vmem [#allocation8], %s303_s10  ;;  %v310_v0 = vld [vmem:[%s1450_s2] sm:$0x1] (!%p1468_p10)  ;;  %vm311_vm0 = vcmask (!%p1468_p10), 253952  }
  0x45   : > { %309 = sbr.rel (%p1468_p10) target bundleno = 76 (0x4c), region = 60  ;;  %312 = vst.msk [vmem:[#allocation2] sm:$0x1] (!%p1468_p10), %vm311_vm0, %v310_v0 }
  0x4c PF: > { %v850_v1 = vld [vmem:[#allocation2] ss:$0 sm:$0xff]  ;;  %s1143_s25 = smov 32   ;;  %v1144_v2 = vmov 0.0   ;;  %v1004_v4 = vld [vmem:[%s1452_s4 + $0x8] sm:$0xff]   ;;  %vm1145_vm1 = vmmov 0  }
  0x4d   : > { %323 = vrot.lane.b32.xlu0 %v850_v1, %s1143_s25  ;;  %892 = vmatprep.subr.bf16.mxu0 %v1144_v2  ;;  %v1003_v3 = vld [vmem:[%s1452_s4] sm:$0xff]   ;;  %v1005_v5 = vld [vmem:[%s1452_s4 + $0x10] sm:$0xff]   ;;  %v1006_v6 = vld [vmem:[%s1452_s4 + $0x18] sm:$0xff]   ;;  %s315_s28 = sld [smem:[#allocation4 + %s1225_s17]]  ;;  %vm326_vm2 = vcmask 261120   ;;  %vm361_vm3 = vcmask 523264  }
  0x4e   : > { %893 = vmatpush3.bf16.msra.mxu0 %v1003_v3  ;;  %900 = vmatprep.mubr.msk.bf16.mxu0 %vm1145_vm1, %v1144_v2  ;;  %v1337_v11 = vld [vmem:[%s1456_s8] sm:$0xff]  ;;  %vm412_vm4 = vcmask 73728   ;;  %v425_v24 = vld [vmem:[%s1451_s3 + $0x8] sm:$0x3]  ;;  %vm430_vm5 = vcmask 1041408   ;;  %v1146_v25 = vmov 0.0|0.0  }
  0x4f   : > { %894 = vmatprep.subr.bf16.mxu0 %v1144_v2  ;;  %908 = vmatprep.mubr.msk.f32.mxu1 %vm1145_vm1, %v1144_v2  ;;  %v424_v23 = vld [vmem:[%s1451_s3] sm:$0xff]  ;;  %vm1147_vm6 = vmmov 1   ;;  %vm426_vm8 = vcmask 80896   ;;  %v1008_v31 = vld [vmem:[%s1453_s5 + $0x8] sm:$0xff]   ;;  %v1009_v32 = vld [vmem:[%s1453_s5 + $0x10] sm:$0xff]   ;;  %v407_v36 = vrot.slane %v1337_v11, 3 }
  0x50   : > { %939 = vmatprep.subr.bf16.mxu1 %v1146_v25  ;;  %v940_v26 = vpack.c.bf16 %v425_v24, %v424_v23  ;;  %vm941_vm7 = vmpackc.low %vm430_vm5, %vm1147_vm6  ;;  %v1007_v30 = vld [vmem:[%s1453_s5] sm:$0xff]   ;;  %v1010_v33 = vld [vmem:[%s1453_s5 + $0x18] sm:$0xff]   ;;  %s1148_s29 = smov 96   ;;  %v542_v44 = vrot.slane %v1337_v11, 1  ;;  %v605_v52 = vrot.slane %v1337_v11, 2  ;;  %vm750_vm9 = vcmask 155648  }
  0x51   : > { %v1011_v37 = vld [vmem:[#allocation5] sm:$0xff]   ;;  %v1012_v43 = vld [vmem:[#allocation5 + $0x8] sm:$0xff]   ;;  %vm683_vm10 = vcmask 253952   ;;  %vm766_vm11 = vcmask 162816   ;;  %vm770_vm12 = vcmask 605184   ;;  %s788_s18 = sshll.u32 %s1291_s11, 4  ;;  %s1405_s18 = int_to_ptr.vmem [resolvable:$true] %s788_s18 }
  0x52   : > { %895 = vmatpush3.bf16.msra.mxu0 %v1004_v4  ;;  %942 = vmatpush3.bf16.msk.msra.mxu1 %vm941_vm7, %v940_v26  ;;  %vm772_vm13 = vcmask 785408   ;;  %p1469_p0 = scmp.ne.s32.totalorder %s1461_s23, 0 }
  0x53   : > { %896 = vmatprep.subr.bf16.mxu0 %v1144_v2  ;;  %s316_s13 = scalar_lea.vmem %s1449_s1, %s315_s28  ;;  %911 = vmatprep.subr.bf16.mxu1 %v1144_v2 }
  0x54   : > { %v1324_v7 = vld [vmem:[%s316_s13] sm:$0x1]  ;;  %s870_s13 = sshll.u32 %s1225_s17, 4  ;;  %s776_s17 = scalar_lea.sflag [#allocation7], %s303_s10 }
  0x55   : > { %s1403_s26 = scalar_lea.hbm %s1457_s9, %s870_s13 }
  0x56   : > { %897 = vmatpush3.bf16.msra.mxu0 %v1005_v5  ;;  %v1013_v5 = vld [vmem:[%s1455_s7] sm:$0xff]  }
  0x57   : > { %898 = vmatprep.subr.bf16.mxu0 %v1144_v2 }
  0x5a   : > { %899 = vmatpush3.bf16.msra.mxu0 %v1006_v6  ;;  %v1014_v6 = vld [vmem:[%s1455_s7 + $0x8] sm:$0xff]  }
  0x5b   : > { %923 = vmatprep.subr.bf16.mxu0 %v1144_v2 }
  0xbf   : > { %v1326_v8 = vpop.permute.xlu0 %323 }
  0xc0   : > { %v327_v9 = vsel %vm326_vm2, %v1324_v7, %v1326_v8 }
  0xc1   : > { %v328_v10 = vpack.c.bf16 %v327_v9, %v327_v9 }
  0xc3   : > { %901 = vmatmul.mubr.msk.bf16.vlgmr.msra.gmra.mrb[0].mxu0 %vm361_vm3, %v328_v10 }
  0xc4   : > { %927 = vmatprep.mubr.msk.bf16.mxu0 %vm1145_vm1, %v1144_v2  ;;  %924 = vmatpush3.bf16.msra.mxu0 %v1011_v37 }
  0xc5   : > { %925 = vmatprep.subr.bf16.mxu0 %v1144_v2 }
  0xc8   : > { %926 = vmatpush3.bf16.msra.mxu0 %v1012_v43 }
 0x196   : > { %v399_v12 = vpop.f32.mrb[0].mxu0 }
 0x197   : > { %v405_v13 = vadd.f32 %v399_v12, %v1337_v11  ;;  %v902_v14 = vpop.f32.mrb[1].mxu0 }
 0x198   : > { %v402_v15 = vpop.f32.mrb[2].mxu0 }
 0x199   : > { %v903_v16 = vpop.f32.mrb[3].mxu0  ;;  %v413_v17 = vsel %vm412_vm4, %v405_v13, -inf }
 0x19a   : > { %414 = vmax.xlane.f32.xlu0 %v413_v17  ;;  %v705_v17 = vrot.slane %v1337_v11, 4 }
 0x227   : > { %v415_v18 = vpop.xlane.xlu0 %414 }
 0x228   : > { %v416_v19 = vsub.f32 %v405_v13, %v415_v18 }
 0x22a   : > { %v417_v20 = vmul.f32 1.442695, %v416_v19 }
 0x22c   : > { %1015 = vpow2.f32 %v417_v20 }
 0x236   : > { %v1016_v21 = vpop.eup %1015 }
 0x237   : > { %v419_v22 = vsel %vm412_vm4, %v1016_v21, 0.0 }
 0x238   : > { %420 = vadd.xlane.f32.xlu1 %v419_v22 }
 0x2c5   : > { %v421_v27 = vpop.xlane.xlu1 %420 }
 0x2c6   : > { %1017 = vrcp.f32 %v421_v27 }
 0x2d0   : > { %v1018_v28 = vpop.eup %1017 }
 0x2d1   : > { %v1347_v29 = vmul.f32 %v1018_v28, %v1016_v21 }
 0x2d3   : > { %909 = vmatmul.mubr.msk.f32.vlgmr.msra.gmra.mrb[0].mxu1 %vm426_vm8, %v1347_v29 }
 0x2d4   : > { %919 = vmatprep.mubr.msk.bf16.mxu1 %vm1145_vm1, %v1144_v2  ;;  %912 = vmatpush3.bf16.msra.mxu1 %v1007_v30 }
 0x2d5   : > { %913 = vmatprep.subr.bf16.mxu1 %v1144_v2 }
 0x2d8   : > { %914 = vmatpush3.bf16.msra.mxu1 %v1008_v31 }
 0x2d9   : > { %915 = vmatprep.subr.bf16.mxu1 %v1144_v2 }
 0x2dc   : > { %916 = vmatpush3.bf16.msra.mxu1 %v1009_v32 }
 0x2dd   : > { %917 = vmatprep.subr.bf16.mxu1 %v1144_v2 }
 0x2e0   : > { %918 = vmatpush3.bf16.msra.mxu1 %v1010_v33 }
 0x2e1   : > { %931 = vmatprep.subr.bf16.mxu1 %v1144_v2 }
 0x3a6   : > { %v500_v34 = vpop.f32.mrb[0].mxu1 }
 0x3a7   : > { %505 = vrot.lane.b32.xlu1 %v500_v34, %s1143_s25  ;;  %v910_v35 = vpop.f32.mrb[1].mxu1 }
 0x3ab   : > { %408 = vrot.lane.b32.xlu1 %v407_v36, %s1143_s25 }
 0x419   : > { %v506_v38 = vpop.permute.xlu1 %505 }
 0x41a   : > { %v508_v39 = vsel %vm326_vm2, %v1324_v7, %v506_v38 }
 0x41b   : > { %v509_v40 = vpack.c.bf16 %v508_v39, %v508_v39 }
 0x41d   : > { %920 = vmatmul.mubr.msk.bf16.vlgmr.msra.gmra.mrb[4].mxu1 %vm361_vm3, %v509_v40  ;;  %v409_v41 = vpop.permute.xlu1 %408 }
 0x41e   : > { %v411_v42 = vadd.f32 %v409_v41, %v399_v12  ;;  %935 = vmatprep.mubr.msk.bf16.mxu1 %vm1145_vm1, %v1144_v2  ;;  %932 = vmatpush3.bf16.msra.mxu1 %v1013_v5 }
 0x41f   : > { %933 = vmatprep.subr.bf16.mxu1 %v1144_v2 }
 0x420   : > { %651 = vrot.lane.b32.xlu1 %v411_v42, %s1148_s29 }
 0x422   : > { %934 = vmatpush3.bf16.msra.mxu1 %v1014_v6 }
 0x424   : > { %661 = vrot.lane.b32.xlu1 %v411_v42, %s1143_s25  ;;  %s1149_s25 = smov 64  }
 0x492   : > { %v652_v56 = vpop.permute.xlu1 %651 }
 0x496   : > { %v662_v0 = vpop.permute.xlu1 %661 }
 0x4f0   : > { %v581_v45 = vpop.f32.mrb[4].mxu1 }
 0x4f1   : > { %v582_v46 = vadd.f32 %v581_v45, %v542_v44  ;;  %v921_v47 = vpop.f32.mrb[5].mxu1 }
 0x4f2   : > { %v584_v48 = vpop.f32.mrb[6].mxu1 }
 0x4f3   : > { %v587_v49 = vmax.f32 %v582_v46, 0.0  ;;  %v922_v50 = vpop.f32.mrb[7].mxu1 }
 0x4f5   : > { %v588_v51 = vpack.c.bf16 %v587_v49, %v587_v49 }
 0x4f7   : > { %928 = vmatmul.mubr.msk.bf16.vlgmr.msra.gmra.mrb[4].mxu0 %vm326_vm2, %v588_v51 }
 0x5ca   : > { %v644_v53 = vpop.f32.mrb[4].mxu0 }
 0x5cb   : > { %v645_v54 = vadd.f32 %v644_v53, %v605_v52  ;;  %v929_v55 = vpop.f32.mrb[5].mxu0 }
 0x5cc   : > { %v647_v57 = vpop.f32.mrb[6].mxu0 }
 0x5cd   : > { %v654_v58 = vadd.f32 %v652_v56, %v645_v54  ;;  %v930_v59 = vpop.f32.mrb[7].mxu0 }
 0x5cf   : > { %v866_v60 = vmul.f32 -1.442695, %v654_v58 }
 0x5d1   : > { %1019 = vpow2.f32 %v866_v60 }
 0x5db   : > { %v1020_v61 = vpop.eup %1019 }
 0x5dc   : > { %v658_v62 = vadd.f32 1.0, %v1020_v61 }
 0x5de   : > { %1021 = vrcp.f32 %v658_v62 }
 0x5e8   : > { %v1022_v63 = vpop.eup %1021 }
 0x5e9   : > { %v664_v1 = vmul.f32 %v1022_v63, %v662_v0  ;;  %v671_v9 = vsub.f32 1.0, %v1022_v63  ;;  %v677_v12 = vmul.f32 %v1022_v63, %v1326_v8 }
 0x5eb   : > { %666 = vrot.lane.b32.xlu1 %v664_v1, %s1149_s25 }
 0x65d   : > { %v667_v3 = vpop.permute.xlu1 %666 }
 0x65e   : > { %v669_v4 = vadd.f32 %v667_v3, %v645_v54 }
 0x660   : > { %1023 = vtanh.f32 %v669_v4 }
 0x66a   : > { %v1024_v7 = vpop.eup %1023 }
 0x66b   : > { %673 = vrot.lane.b32.xlu0 %v1024_v7, %s1148_s29 }
 0x6dd   : > { %v674_v10 = vpop.permute.xlu0 %673 }
 0x6de   : > { %v676_v13 = vmul.f32 %v674_v10, %v671_v9 }
 0x6e0   : > { %v678_v14 = vadd.f32 %v677_v12, %v676_v13 }
 0x6e2   : > { %v685_v15 = vpack.c.bf16 %v678_v14, %v678_v14 }
 0x6e4   : > { %691 = vrot.lane.b32.xlu1 %v685_v15, %s1148_s29 }
 0x756   : > { %v692_v16 = vpop.permute.xlu1 %691 }
 0x757   : > { %936 = vmatmul.mubr.msk.bf16.vlgmr.msra.gmra.mrb[8].mxu1 %vm326_vm2, %v692_v16 }
 0x82a   : > { %v744_v18 = vpop.f32.mrb[8].mxu1 }
 0x82b   : > { %v745_v2 = vadd.f32 %v744_v18, %v705_v17  ;;  %v937_v19 = vpop.f32.mrb[9].mxu1 }
 0x82c   : > { %v747_v20 = vpop.f32.mrb[10].mxu1 }
 0x82d   : > { %v938_v21 = vpop.f32.mrb[11].mxu1  ;;  %v751_v22 = vsel %vm750_vm9, %v745_v2, -inf }
 0x82e   : > { %752 = vmax.xlane.f32.xlu1 %v751_v22 }
 0x83f   : > { %763 = vrot.lane.b32.xlu1 %v1347_v29, %s1149_s25  ;;  %s1150_s25 = smov [#allocation8]  }
 0x840   : > { %s1073_s30 = sshll.u32 %s1150_s25, 4  ;;  %s1074_s30 = int_to_ptr.vmem [resolvable:$false] %s1073_s30 }
 0x841   : > { %s1075_s28 = scalar_lea.vmem %s1074_s30, 32  ;;  %p1076_p4 = scmp.lt.s32.totalorder %s1405_s18, %s1074_s30 }
 0x8bb   : > { %v753_v8 = vpop.xlane.xlu1 %752 }
 0x8bc   : > { %v754_v23 = vsub.f32 %v745_v2, %v753_v8 }
 0x8be   : > { %v755_v24 = vmul.f32 1.442695, %v754_v23 }
 0x8bf   : > { %v764_v32 = vpop.permute.xlu1 %763 }
 0x8c0   : > { %1025 = vpow2.f32 %v755_v24 }
 0x8ca   : > { %v1026_v25 = vpop.eup %1025 }
 0x8cb   : > { %v757_v26 = vsel %vm750_vm9, %v1026_v25, 0.0 }
 0x8cc   : > { %758 = vadd.xlane.f32.xlu0 %v757_v26 }
 0x8e2   : > { %680 = vrot.lane.b32.xlu0 %v678_v14, %s1148_s29  ;;  %s1069_s29 = scalar_lea.vmem %s1405_s18, 16 }
 0x8e3   : > { %p1070_p11 = scmp.ne.s32.totalorder %s1405_s18, %s1069_s29  ;;  %p1077_p8 = scmp.lt.s32.totalorder %s1075_s28, %s1069_s29 }
 0x8e5   : > { %p1071_p1 = pnand %p1070_p11, %p1469_p0  ;;  %p1078_p9 = por %p1077_p8, %p1076_p4 }
 0x8e7   : > { %p1072_p2 = pneg %p1071_p1 }
 0x8e9   : > { %p1079_p12 = pnand %p1078_p9, %p1072_p2 }
 0x959   : > { %v759_v11 = vpop.xlane.xlu0 %758 }
 0x95a   : > { %1027 = vlog2.f32 %v759_v11 }
 0x95d   : > { %v681_v27 = vpop.permute.xlu0 %680 }
 0x95e   : > { %684 = vst.msk [vmem:[#allocation2] sm:$0x1] %vm683_vm10, %v681_v27 }
 0x964   : > { %v1028_v28 = vpop.eup %1027 }
 0x965   : > { %v761_v30 = vmul.f32 0.6931472, %v1028_v28 }
 0x967   : > { %v762_v29 = vsub.f32 %v754_v23, %v761_v30 }
 0x969   : > { %v767_v31 = vsel %vm766_vm11, %v762_v29, 0.0 }
 0x96a   : > { %v768_v33 = vsel %vm326_vm2, %v767_v31, %v678_v14 }
 0x96b   : > { %v769_v34 = vsel %vm361_vm3, %v768_v33, %v764_v32 }
 0x96c   : > { %v771_v35 = vsel %vm770_vm12, %v769_v34, 0.0 }
 0x96d   : > { %v773_v36 = vsel %vm772_vm13, %v771_v35, 0.0 }
 0x96e   : > { %774 = vst [vmem:[%s1291_s11] sm:$0x1] %v773_v36 }
 0x96f   : > { %1082 = shalt.err (!%p1079_p12)
}
 0x970   : > { %s1083_s10 = scalar_lea.hbm %s1403_s26, 16  ;;  %s1087_s12 = scalar_lea.hbm %s1457_s9, 160 }
 0x971   : > { %p1084_p13 = scmp.ne.s32.totalorder %s1403_s26, %s1083_s10  ;;  %p1088_p7 = scmp.lt.u32.totalorder %s1403_s26, %s1457_s9 }
 0x972   : > { %p1089_p6 = scmp.lt.u32.totalorder %s1087_s12, %s1083_s10  ;;  %p1091_p11 = scmp.lt.u32.totalorder %s1083_s10, %s1403_s26 }
 0x973   : > { %p1085_p3 = pnand %p1084_p13, %p1469_p0 }
 0x974   : > { %p1090_p10 = por %p1089_p6, %p1088_p7 }
 0x975   : > { %p1086_p5 = pneg %p1085_p3 }
 0x976   : > { %p1092_p1 = por %p1091_p11, %p1090_p10 }
 0x978   : > { %p1093_p2 = pnand %p1092_p1, %p1086_p5 }
 0x97a   : > { %1096 = shalt.err (!%p1093_p2)
}
 0x97b   : > { %947 = dma.vmem_to_hbm [thread:$0]  (%p1469_p0), %s1405_s18, 16, %s1403_s26, %s776_s17  }
 0x97c PF: > { %p959_p4 = scmp.ge.s32.totalorder %s1137_s16, 2  ;;  %s800_s21 = sand.u32 1, %s1125_s14  }
 0x97d   : > { %p1470_p8 = scmp.ne.s32.totalorder %s1462_s24, 0  ;;  %s801_s29 = scalar_lea.sflag [#allocation7], %s800_s21 }
 0x97f   : > { %p954_p9 = pnand %p959_p4, %p1470_p8 }
 0x981   : > { %1120 = dma.done.wait (!%p954_p9), %s801_s29, 16  }
 0x982   : > { %1122 = vsyncadd (!%p954_p9), %s801_s29, 4294967280  ;;  %p26_p12 = scmp.ge.s32.totalorder %s1229_s19, 12   ;;  %s1471_s14 = smov %s1129_s15 }
 0x983   : > { %s1472_s15 = smov %s1133_s0  ;;  %s1473_s0 = smov %s1240_s22 }
 0x984   : > { %s1474_s16 = smov %s1229_s19  ;;  %28 = sbr.rel (!%p26_p12) target bundleno = 19 (0x13), region = 94 }
 0x98b   :  { %805 = vsyncpa [#allocation6], 1 }
 0x98c   :  { %807 = vsyncpa [#allocation6 + $0x1], 1 }
 0x98d   :  { %808 = vsyncpa [#allocation7], 1 }
 0x98e   :  { %810 = vsyncpa [#allocation7 + $0x1], 1 }

</bundles_post_ra>
